<compile_context>
chip_gen: v7x
topology: tpu7x:2x2x1
jax: 0.10.0
libtpu: 0.0.40
codegen_flags: <defaults>
</compile_context>

<pallas_src>
import jax
import jax.numpy as jnp
from jax.experimental import pallas as pl
from jax.experimental.pallas import tpu as pltpu


def _attn_classify_kernel(sim_ref, y_ref, out_ref):
    # sim_ref: [TB, S] (native dtype) ; y_ref: [S, Cp] bf16 ; out_ref: [TB, Cp]
    s = sim_ref[...].astype(jnp.float32)
    # numerically-stable softmax numerator along the support (last) axis
    m = jnp.max(s, axis=-1, keepdims=True)
    e = jnp.exp(s - m)
    denom = jnp.sum(e, axis=-1, keepdims=True)
    # attention-weighted sum of one-hot support labels on the MXU:
    # bf16 operands (full-rate on v5e/v6e/v7x), f32 accumulate, normalize after the dot
    acc = jnp.dot(
        e.astype(jnp.bfloat16), y_ref[...], preferred_element_type=jnp.float32
    )
    out_ref[...] = (acc * pl.reciprocal(denom, approx=True)).astype(out_ref.dtype)


def _vmem_capacity_bytes() -> int:
    try:
        info = pltpu.get_tpu_info()
        return int(getattr(info, "vmem_capacity_bytes", 64 * 1024 * 1024))
    except Exception:
        return 64 * 1024 * 1024  # conservative (v7x per-TC) fallback


def attentional_classify(similarities: jax.Array, support_set_y: jax.Array) -> jax.Array:
    """similarities: [B, S], support_set_y: [S, C] -> preds [B, C] (then squeeze)."""
    B, S = similarities.shape
    S2, C = support_set_y.shape
    assert S == S2, "support-set length must match"

    out_dtype = jnp.promote_types(similarities.dtype, support_set_y.dtype)

    # bf16 one-hot labels: exact for {0,1}, halves y HBM traffic / VMEM footprint,
    # and keeps both MXU operands at full rate. (~1e-3 error if y is ever soft labels.)
    y = support_set_y.astype(jnp.bfloat16)

    # Lane-dense class padding only pays when C is already large; for few-shot C the
    # padded writeback would dominate HBM traffic in this mem-bound kernel.
    if C > 128 and C % 128 != 0:
        Cp = ((C + 127) // 128) * 128
        y = jnp.pad(y, ((0, 0), (0, Cp - C)))
    else:
        Cp = C

    sim_itemsize = jnp.dtype(similarities.dtype).itemsize
    out_itemsize = jnp.dtype(out_dtype).itemsize

    # ---- chip-aware batch-tile sizing -------------------------------------------------
    vmem_cap = _vmem_capacity_bytes()
    budget = int(vmem_cap * 0.4)  # ~51 MiB on v5e/v6e (128 MiB), ~25 MiB on v7x (64 MiB)

    y_bytes = S * Cp * 2  # bf16, single-buffered (constant block index, pl.Buffered(1))
    per_row = (
        2 * S * sim_itemsize      # double-buffered similarities tile
        + 2 * Cp * out_itemsize   # double-buffered output tile
        + 3 * S * 4 + Cp * 4      # live f32 intermediates (s, e, acc)
    )

    # sublane packing: 8 rows/vreg for 32-bit, 16 for bf16, 32 for int8/fp8
    align = max(8, 32 // max(sim_itemsize, 1))
    tb = max(align, (budget - y_bytes) // max(per_row, 1))
    if B > align:
        # keep >=2 grid steps so "parallel" can shard work across v7x's 2 TensorCores
        tb = min(tb, -(-B // 2))
    tb = max(align, (tb // align) * align)
    TB = B if tb >= B else tb  # full-extent block is always legal

    grid = (pl.cdiv(B, TB),)

    # Raise the scoped-VMEM limit to cover the chosen tiles (default 16/32 MiB).
    vmem_need = y_bytes + TB * per_row
    vmem_limit = min(int(0.9 * vmem_cap), max(32 * 1024 * 1024, vmem_need + (8 << 20)))

    preds = pl.pallas_call(
        _attn_classify_kernel,
        out_shape=jax.ShapeDtypeStruct((B, Cp), out_dtype),
        grid_spec=pltpu.PrefetchScalarGridSpec(
            num_scalar_prefetch=0,
            grid=grid,
            in_specs=[
                # batch tile, full support length per row (softmax needs the whole row).
                # NOTE: when B % TB != 0 the last tile's padded rows compute garbage,
                # but their output rows are discarded by the partial output block.
                pl.BlockSpec((TB, S), lambda i: (i, 0)),
                # constant block index -> labels stay resident; one buffer is enough
                pl.BlockSpec((S, Cp), lambda i: (0, 0), pipeline_mode=pl.Buffered(1)),
            ],
            out_specs=pl.BlockSpec((TB, Cp), lambda i: (i, 0)),
        ),
        compiler_params=pltpu.CompilerParams(
            dimension_semantics=("parallel",),
            vmem_limit_bytes=vmem_limit,
        ),
    )(similarities, y)

    if Cp != C:
        preds = preds[:, :C]
    # mirror PyTorch's .squeeze()
    return jnp.squeeze(preds)
    # TODO(synk): if S grows past the VMEM row budget, add an S reduction grid axis
    # with an online-softmax accumulator instead of loading full rows.


if __name__ == "__main__":
    key = jax.random.PRNGKey(0)
    k_sim, k_lbl = jax.random.split(key)

    batch = 2          # target (query) batch
    seq = 8            # support-set sequence length
    num_classes = 5

    # cosine-similarity-like inputs in [-1, 1]
    similarities = jax.random.uniform(
        k_sim, (batch, seq), minval=-1.0, maxval=1.0, dtype=jnp.float32
    )
    # deterministic one-hot support labels
    labels = jax.random.randint(k_lbl, (seq,), 0, num_classes)
    support_set_y = jax.nn.one_hot(labels, num_classes, dtype=jnp.float32)

    preds = attentional_classify(similarities, support_set_y)
    preds = jax.block_until_ready(preds)

    # pure-JAX reference check (tolerance covers bf16 operands + approx reciprocal)
    ref = jnp.squeeze(jnp.matmul(jax.nn.softmax(similarities, axis=-1), support_set_y))
    assert preds.shape == ref.shape, (preds.shape, ref.shape)
    assert jnp.allclose(preds, ref, atol=1e-2, rtol=1e-2), (preds, ref)

    print("KERNEL_OK")
</pallas_src>

<mosaic_0001>
module attributes {stable_mosaic.version = 11 : i64} {
  func.func @_attn_classify_kernel(%arg0: i32, %arg1: memref<2x8xf32, #tpu.memory_space<vmem>>, %arg2: memref<8x5xbf16, #tpu.memory_space<vmem>>, %arg3: memref<2x5xf32, #tpu.memory_space<vmem>>) attributes {dimension_semantics = [#tpu.dimension_semantics<parallel>], iteration_bounds = array<i64: 1>, scalar_prefetch = 0 : i64, scratch_operands = 0 : i64, tpu.core_type = #tpu.core_type<tc>, window_params = [{transform_indices = @transform_0, window_bounds = array<i64: 2, 8>}, {pipeline_mode = #tpu.pipeline_mode<synchronous>, transform_indices = @transform_1, window_bounds = array<i64: 8, 5>}, {transform_indices = @transform_2, window_bounds = array<i64: 2, 5>}]} {
    %c0 = arith.constant 0 : index
    %c0_0 = arith.constant 0 : index
    %0 = vector.load %arg1[%c0, %c0_0] : memref<2x8xf32, #tpu.memory_space<vmem>>, vector<2x8xf32>
    %cst = arith.constant dense<0xFF800000> : vector<2xf32>
    %1 = vector.multi_reduction <maximumf>, %0, %cst [1] : vector<2x8xf32> to vector<2xf32>
    %2 = vector.shape_cast %1 : vector<2xf32> to vector<2x1xf32>
    %3 = vector.broadcast %2 : vector<2x1xf32> to vector<2x8xf32>
    %4 = arith.subf %0, %3 : vector<2x8xf32>
    %5 = math.exp %4 : vector<2x8xf32>
    %cst_1 = arith.constant dense<0.000000e+00> : vector<2xf32>
    %6 = vector.multi_reduction <add>, %5, %cst_1 [1] : vector<2x8xf32> to vector<2xf32>
    %7 = vector.shape_cast %6 : vector<2xf32> to vector<2x1xf32>
    %8 = arith.truncf %5 : vector<2x8xf32> to vector<2x8xbf16>
    %c0_2 = arith.constant 0 : index
    %c0_3 = arith.constant 0 : index
    %9 = vector.load %arg2[%c0_2, %c0_3] : memref<8x5xbf16, #tpu.memory_space<vmem>>, vector<8x5xbf16>
    %cst_4 = arith.constant dense<0.000000e+00> : vector<2x5xf32>
    %10 = tpu.matmul %8, %9, %cst_4 {dimension_numbers = #tpu.dot_dimension_numbers<[1], [0], [0], [1], [0, 0, 1, 1], [], []>} : vector<2x8xbf16>, vector<8x5xbf16>, vector<2x5xf32> -> vector<2x5xf32>
    %11 = tpu.reciprocal %7 {approx = true} : vector<2x1xf32> -> vector<2x1xf32>
    %12 = vector.broadcast %11 : vector<2x1xf32> to vector<2x5xf32>
    %13 = arith.mulf %10, %12 : vector<2x5xf32>
    %c0_5 = arith.constant 0 : index
    %c0_6 = arith.constant 0 : index
    %14 = vector.load %arg3[%c0_5, %c0_6] : memref<2x5xf32, #tpu.memory_space<vmem>>, vector<2x5xf32>
    tpu.vector_store %arg3[%c0_5, %c0_6], %13 {strides = array<i32>} : memref<2x5xf32, #tpu.memory_space<vmem>>, vector<2x5xf32>,
    return
  }
  func.func @transform_0(%arg0: i32) -> (i32, i32) {
    %c0_i32 = arith.constant 0 : i32
    %c0_i32_0 = arith.constant 0 : i32
    return %arg0, %c0_i32 : i32, i32
  }
  func.func @transform_1(%arg0: i32) -> (i32, i32) {
    %c0_i32 = arith.constant 0 : i32
    %c0_i32_0 = arith.constant 0 : i32
    %c0_i32_1 = arith.constant 0 : i32
    return %c0_i32, %c0_i32_0 : i32, i32
  }
  func.func @transform_2(%arg0: i32) -> (i32, i32) {
    %c0_i32 = arith.constant 0 : i32
    %c0_i32_0 = arith.constant 0 : i32
    return %arg0, %c0_i32 : i32, i32
  }
}

</mosaic_0001>

<bundles_post_ra>
// kernel: tpu_custom_call.1
= control target key start
LH: loop header
LB: loop body
LE: loop exit
PB: predicated region body
PF: predicated region fallthrough
CT: control target
= control target key end

     0   :  { %7 = vsyncpa [#allocation3], 0  ;;  %s266_s0 = inlined_call_operand.hbm [shape: f32[2,8], index: 0, kind: input, shape index: {}]   ;;  %s267_s1 = inlined_call_operand.hbm [shape: bf16[8,5], index: 1, kind: input, shape index: {}]   ;;  %s268_s2 = inlined_call_operand.hbm [shape: f32[2,5], index: 2, kind: output, shape index: {}]  }
   0x1   :  { %8 = vsyncpa [#allocation6], 0 }
   0x2   :  { %9 = vsyncpa [#allocation4], 0  ;;  %s208_s9 = smov [#allocation2]   ;;  %s209_s11 = smov [#allocation5]  }
   0x3   :  { %s16_s10 = sshll.u32 %s208_s9, 4  ;;  %s26_s12 = sshll.u32 %s209_s11, 4  ;;  %s17_s10 = int_to_ptr.vmem [resolvable:$true] %s16_s10  ;;  %s27_s12 = int_to_ptr.vmem [resolvable:$true] %s26_s12 }
   0x4   :  { %s136_s15 = scalar_lea.hbm %s266_s0, 32 }
   0x5   :  { %p137_p0 = scmp.ne.s32.totalorder %s266_s0, %s136_s15  ;;  %p140_p1 = scmp.lt.u32.totalorder %s136_s15, %s266_s0 }
   0x7   :  { %p142_p2 = pnand %p140_p1, %p137_p0 }
   0x9   :  { %145 = shalt.err (!%p142_p2)
}
   0xa   :  { %s146_s20 = scalar_lea.vmem %s17_s10, 32  ;;  %p151_p4 = scmp.lt.s32.totalorder %s17_s10, %s17_s10 }
   0xb   :  { %p147_p3 = scmp.ne.s32.totalorder %s17_s10, %s146_s20  ;;  %p152_p5 = scmp.lt.s32.totalorder %s146_s20, %s146_s20 }
   0xd   :  { %p153_p6 = por %p152_p5, %p151_p4 }
   0xf   :  { %p154_p7 = pnand %p153_p6, %p147_p3 }
  0x11   :  { %157 = shalt.err (!%p154_p7)
}
  0x12   :  { %19 = dma.hbm_to_vmem [thread:$0]  %s266_s0, 32, %s17_s10, [#allocation3]  }
  0x13   :  { %s158_s25 = scalar_lea.hbm %s267_s1, 64 }
  0x14   :  { %p159_p8 = scmp.ne.s32.totalorder %s267_s1, %s158_s25  ;;  %p162_p9 = scmp.lt.u32.totalorder %s158_s25, %s267_s1 }
  0x16   :  { %p164_p10 = pnand %p162_p9, %p159_p8 }
  0x18   :  { %167 = shalt.err (!%p164_p10)
}
  0x19   :  { %s168_s30 = scalar_lea.vmem %s27_s12, 64  ;;  %p173_p12 = scmp.lt.s32.totalorder %s27_s12, %s27_s12 }
  0x1a   :  { %p169_p11 = scmp.ne.s32.totalorder %s27_s12, %s168_s30  ;;  %p174_p13 = scmp.lt.s32.totalorder %s168_s30, %s168_s30 }
  0x1c   :  { %p175_p0 = por %p174_p13, %p173_p12 }
  0x1e   :  { %p176_p1 = pnand %p175_p0, %p169_p11 }
  0x20   :  { %179 = shalt.err (!%p176_p1)
}
  0x21   :  { %29 = dma.hbm_to_vmem [thread:$0]  %s267_s1, 64, %s27_s12, [#allocation6]  }
  0x22   :  { %202 = dma.done.wait [#allocation3], 32  }
  0x23   :  { %203 = vsyncadd [#allocation3], 4294967264 }
  0x24   :  { %204 = dma.done.wait [#allocation6], 64  }
  0x25   :  { %205 = vsyncadd [#allocation6], 4294967232  ;;  %vm38_vm0 = vcmask 58368   ;;  %v37_v0 = vld [vmem:[#allocation2] sm:$0x3]  ;;  %vm54_vm1 = vcmask 1043456  }
  0x26   :  { %v39_v1 = vsel %vm38_vm0, %v37_v0, -inf  ;;  %v49_v2 = vld [vmem:[#allocation5] sm:$0xf]  ;;  %v210_v3 = vmov 0.0   ;;  %vm211_vm2 = vmmov 0   ;;  %vm50_vm3 = vcmask 64512  }
  0x27   :  { %40 = vmax.xlane.f32.xlu0 %v39_v1  ;;  %121 = vmatprep.subr.bf16.mxu0 %v210_v3  ;;  %v56_v4 = vsel %vm54_vm1, %v49_v2, 0  ;;  %s212_s1 = smov [#allocation7]   ;;  %vm100_vm4 = vcmask 33792  }
  0x28   :  { %123 = vmatprep.mubr.msk.bf16.mxu0 %vm211_vm2, %v210_v3  ;;  %122 = vmatpush3.bf16.msra.mxu0 %v56_v4  ;;  %s108_s4 = sshll.u32 %s212_s1, 4  ;;  %s109_s4 = int_to_ptr.vmem [resolvable:$true] %s108_s4 }
  0x29   :  { %s180_s5 = scalar_lea.vmem %s109_s4, 32  ;;  %p185_p3 = scmp.lt.s32.totalorder %s109_s4, %s109_s4 }
  0x2a   :  { %p181_p2 = scmp.ne.s32.totalorder %s109_s4, %s180_s5  ;;  %p186_p4 = scmp.lt.s32.totalorder %s180_s5, %s180_s5 }
  0x2c   :  { %p187_p5 = por %p186_p4, %p185_p3 }
  0x2e   :  { %p188_p6 = pnand %p187_p5, %p181_p2 }
  0xb4   :  { %v41_v5 = vpop.xlane.xlu0 %40 }
  0xb5   :  { %v42_v6 = vsub.f32 %v37_v0, %v41_v5 }
  0xb7   :  { %v43_v7 = vmul.f32 1.442695, %v42_v6 }
  0xb9   :  { %132 = vpow2.f32 %v43_v7 }
  0xc3   :  { %v133_v8 = vpop.eup %132 }
  0xc4   :  { %v45_v9 = vsel %vm38_vm0, %v133_v8, 0.0  ;;  %v48_v10 = vpack.c.bf16 %v133_v8, %v133_v8 }
  0xc5   :  { %46 = vadd.xlane.f32.xlu0 %v45_v9 }
  0xc6   :  { %124 = vmatmul.mubr.msk.bf16.vlgmr.msra.gmra.mrb[0].mxu0 %vm50_vm3, %v48_v10 }
 0x152   :  { %v47_v11 = vpop.xlane.xlu0 %46 }
 0x153   :  { %134 = vrcp.f32 %v47_v11 }
 0x15d   :  { %v135_v12 = vpop.eup %134 }
 0x199   :  { %v92_v13 = vpop.f32.mrb[0].mxu0 }
 0x19a   :  { %v99_v14 = vmul.f32 %v135_v12, %v92_v13  ;;  %v125_v15 = vpop.f32.mrb[1].mxu0 }
 0x19b   :  { %v95_v16 = vpop.f32.mrb[2].mxu0 }
 0x19c   :  { %v126_v17 = vpop.f32.mrb[3].mxu0  ;;  %101 = vst.msk [vmem:[#allocation7] sm:$0x3] %vm100_vm4, %v99_v14 }
 0x19d   :  { %191 = shalt.err (!%p188_p6)
}
 0x19e   :  { %s192_s8 = scalar_lea.hbm %s268_s2, 32 }
 0x19f   :  { %p193_p7 = scmp.ne.s32.totalorder %s268_s2, %s192_s8  ;;  %p196_p8 = scmp.lt.u32.totalorder %s192_s8, %s268_s2 }
 0x1a1   :  { %p198_p9 = pnand %p196_p8, %p193_p7 }
 0x1a3   :  { %201 = shalt.err (!%p198_p9)
}
 0x1a4   :  { %111 = dma.vmem_to_hbm [thread:$0]  %s109_s4, 32, %s268_s2, [#allocation4]  }
 0x1a5   :  { %206 = dma.done.wait [#allocation4], 32  }
 0x1a6   :  { %207 = vsyncadd [#allocation4], 4294967264 }
 0x1a7   :  { %115 = vsyncpa [#allocation3], 1 }
 0x1a8   :  { %116 = vsyncpa [#allocation6], 1 }
 0x1a9   :  { %117 = vsyncpa [#allocation4], 1 }

</bundles_post_ra>
